<compile_context>
chip_gen: v5e
topology: v5e:2x2
jax: 0.10.0
libtpu: 0.0.40
codegen_flags: <defaults>
</compile_context>

<pallas_src>
import functools

import jax
import jax.numpy as jnp
import numpy as np
from jax.experimental import pallas as pl
from jax.experimental.pallas import tpu as pltpu


def _round_up(x, m):
    return (x + m - 1) // m * m


def _combined_conv_kernel(x_ref, w_ref, b_ref, o_ref, unf_ref, *,
                          k_len, t_out, b_tile, c_pad):
    """One batch tile per grid step.

    x_ref:   (b_tile, c_pad, T)         compute dtype, channels on sublanes, time on lanes
    w_ref:   (f_pad, k_len * c_pad)     compute dtype, fused weight (resident)
    b_ref:   (f_pad, 1)                 f32, fused bias (resident)
    o_ref:   (b_tile, f_pad, t_out)     out dtype, time on lanes -> lane-dense stores
    unf_ref: (2, k_len * c_pad, t_out)  compute dtype, double-buffered im2col scratch
    """
    def body(b, carry):
        slot = b % 2                                   # alternate scratch buffers
        xb = x_ref[b]                                  # (c_pad, T), compute dtype, no casts
        # im2col: unf[k*c_pad + c, t] = x[c, t + k]; row blocks are sublane-tile aligned
        # because c_pad is a multiple of the compute-dtype sublane tile.
        for k in range(k_len):                         # small static tap loop
            unf_ref[slot, k * c_pad:(k + 1) * c_pad, :] = xb[:, k:k + t_out]
        # Single MXU matmul per batch element: contraction merged over taps*channels.
        y = jnp.dot(w_ref[...], unf_ref[slot],
                    preferred_element_type=jnp.float32)          # (f_pad, t_out) f32
        o_ref[b] = (y + b_ref[...]).astype(o_ref.dtype)          # bias bcast over time
        return carry

    jax.lax.fori_loop(0, b_tile, body, 0)


def combined_conv_forward_nct(x_nct, conv_time_w, conv_time_b,
                              conv_spat_w, conv_spat_b,
                              bias_time=True, bias_spat=True,
                              compute_dtype=jnp.bfloat16, out_dtype=jnp.float32):
    """x_nct: (N, C, T) -> (N, F_spat, T_out).  compute_dtype=bf16 trades ~3 decimal
    digits for roughly half the VMEM/HBM traffic; pass float32 for full parity."""
    n, c, t = x_nct.shape
    f_time, _, k_len, _ = conv_time_w.shape
    f_spat = conv_spat_w.shape[0]
    t_out = t - k_len + 1

    cdt = jnp.dtype(compute_dtype)
    sub = 16 if cdt.itemsize == 2 else 8           # sublane tile of the compute dtype
    c_pad = _round_up(c, sub)                      # aligned channel count (zero-padded)
    f_pad = _round_up(f_spat, 8)                   # sublane-tidy filter count

    # ---- parameter fusion (tiny, plain JAX glue) -----------------------------
    wt = conv_time_w[:, 0, :, 0]                             # (F_time, K)
    ws = conv_spat_w[:, :, 0, :]                             # (F_spat, F_time, C)
    w_fkc = jnp.einsum('tk,ftc->fkc', wt, ws)                # (F_spat, K, C)
    w_fkc = jnp.pad(w_fkc, ((0, f_pad - f_spat), (0, 0), (0, c_pad - c)))
    # w_flat[f, k*c_pad + c] = combined_weight[f, k, c]; padded entries are zero.
    w_flat = w_fkc.reshape(f_pad, k_len * c_pad).astype(compute_dtype)

    bias = jnp.zeros((f_spat,), jnp.float32)
    if bias_time:
        bias = bias + (ws.sum(-1) @ conv_time_b).astype(jnp.float32)
    if bias_spat:
        bias = bias + conv_spat_b.astype(jnp.float32)
    # (Both biases off -> PyTorch uses bias=None; zeros are equivalent.)
    bias = jnp.pad(bias, (0, f_pad - f_spat)).reshape(f_pad, 1)

    # ---- batch tile from a per-generation VMEM budget; even grid for v7x -----
    out_bytes = jnp.dtype(out_dtype).itemsize
    per_b = 2 * (c_pad * t * cdt.itemsize + f_pad * t_out * out_bytes)     # dbl-buf x + out
    fixed = (2 * k_len * c_pad * t_out * cdt.itemsize                      # im2col (2 slots)
             + 2 * (f_pad * k_len * c_pad * cdt.itemsize + f_pad * 4))     # weight + bias
    try:
        vmem_cap = int(pltpu.get_tpu_info().vmem_capacity_bytes)
    except Exception:
        vmem_cap = 64 << 20                       # conservative (v7x per-core VMEM)
    budget = max(per_b, vmem_cap // 2 - fixed)    # keep <~half of VMEM for blocks
    b_tile = max(1, min(n, budget // per_b))
    steps = pl.cdiv(n, b_tile)
    if n > 1:
        steps = max(2, steps + (steps % 2))       # even #steps: both v7x cores, pipelined
    b_tile = pl.cdiv(n, steps)
    n_pad = steps * b_tile

    vmem_limit = int(min(max(per_b * b_tile + fixed + (8 << 20), 16 << 20), vmem_cap))

    # ---- input layout: (N_pad, C_pad, T) in compute dtype, time on lanes -----
    x_p = jnp.pad(x_nct.astype(compute_dtype),
                  ((0, n_pad - n), (0, c_pad - c), (0, 0)))

    kernel = functools.partial(_combined_conv_kernel, k_len=k_len, t_out=t_out,
                               b_tile=b_tile, c_pad=c_pad)
    out = pl.pallas_call(
        kernel,
        out_shape=jax.ShapeDtypeStruct((n_pad, f_pad, t_out), out_dtype),
        grid=(steps,),
        in_specs=[
            pl.BlockSpec((b_tile, c_pad, t), lambda i: (i, 0, 0)),       # x batch tile
            pl.BlockSpec((f_pad, k_len * c_pad), lambda i: (0, 0)),      # fused weight
            pl.BlockSpec((f_pad, 1), lambda i: (0, 0)),                  # fused bias
        ],
        out_specs=pl.BlockSpec((b_tile, f_pad, t_out), lambda i: (i, 0, 0)),
        scratch_shapes=[pltpu.VMEM((2, k_len * c_pad, t_out), compute_dtype)],
        compiler_params=pltpu.CompilerParams(
            dimension_semantics=("parallel",),
            vmem_limit_bytes=vmem_limit),
    )(x_p, w_flat, bias)

    # Already (N, F, T_out): just strip the padding.
    return out[:n, :f_spat, :]


def combined_conv_forward(x_nchw, conv_time_w, conv_time_b,
                          conv_spat_w, conv_spat_b,
                          bias_time=True, bias_spat=True,
                          compute_dtype=jnp.bfloat16, out_dtype=jnp.float32):
    """PyTorch-layout entry point: x_nchw (N, 1, T, C) -> (N, F_spat, T_out, 1)."""
    x_nct = jnp.transpose(x_nchw[:, 0, :, :], (0, 2, 1))     # (N, C, T)
    out = combined_conv_forward_nct(x_nct, conv_time_w, conv_time_b,
                                    conv_spat_w, conv_spat_b,
                                    bias_time=bias_time, bias_spat=bias_spat,
                                    compute_dtype=compute_dtype, out_dtype=out_dtype)
    return out[..., None]                                     # (N, F_spat, T_out, 1)


if __name__ == "__main__":
    def _ref_forward(x, ctw, ctb, csw, csb):
        # Fused-weight conv via XLA (f32) for numerical sanity.
        wt = ctw[:, 0, :, 0]
        ws = csw[:, :, 0, :]
        comb = jnp.einsum('tk,ftc->fkc', wt, ws)[:, None, :, :]        # (F_spat,1,K,C)
        bias = ws.sum(-1) @ ctb + csb
        y = jax.lax.conv_general_dilated(
            x, comb, window_strides=(1, 1), padding='VALID',
            dimension_numbers=('NCHW', 'OIHW', 'NCHW'))
        return y + bias[None, :, None, None]

    def _make_inputs(key, n, c, t, f_time, f_spat, k_len):
        k1, k2, k3, k4, k5 = jax.random.split(key, 5)
        x = jax.random.normal(k1, (n, 1, t, c), dtype=jnp.float32)     # NCHW
        bt = 1.0 / np.sqrt(1 * k_len * 1)
        ctw = jax.random.uniform(k2, (f_time, 1, k_len, 1), jnp.float32, -bt, bt)
        ctb = jax.random.uniform(k3, (f_time,), jnp.float32, -bt, bt)
        bs = 1.0 / np.sqrt(f_time * 1 * c)
        csw = jax.random.uniform(k4, (f_spat, f_time, 1, c), jnp.float32, -bs, bs)
        csb = jax.random.uniform(k5, (f_spat,), jnp.float32, -bs, bs)
        return x, ctw, ctb, csw, csb

    key = jax.random.PRNGKey(0)
    k_a, k_b = jax.random.split(key)

    # Case 1: default bf16 compute path, small module-consistent shapes.
    x, ctw, ctb, csw, csb = _make_inputs(k_a, n=2, c=4, t=32, f_time=8, f_spat=8, k_len=5)
    fwd = jax.jit(combined_conv_forward)
    out = jax.block_until_ready(fwd(x, ctw, ctb, csw, csb))
    assert out.shape == (2, 8, 32 - 5 + 1, 1), out.shape
    ref = _ref_forward(x, ctw, ctb, csw, csb)
    err = float(np.max(np.abs(np.asarray(out) - np.asarray(ref))))
    assert np.allclose(np.asarray(out), np.asarray(ref), atol=5e-2, rtol=5e-2), err

    # Case 2: f32 compute path with odd sizes (channel/filter padding, multi-batch tile,
    # padded batch rows) to exercise the fori_loop / double-buffer path.
    x, ctw, ctb, csw, csb = _make_inputs(k_b, n=5, c=3, t=40, f_time=6, f_spat=10, k_len=7)
    fwd32 = jax.jit(functools.partial(combined_conv_forward, compute_dtype=jnp.float32))
    out = jax.block_until_ready(fwd32(x, ctw, ctb, csw, csb))
    assert out.shape == (5, 10, 40 - 7 + 1, 1), out.shape
    ref = _ref_forward(x, ctw, ctb, csw, csb)
    err = float(np.max(np.abs(np.asarray(out) - np.asarray(ref))))
    assert np.allclose(np.asarray(out), np.asarray(ref), atol=5e-2, rtol=5e-2), err

    print("KERNEL_OK")
</pallas_src>

<mosaic_0001>
module attributes {stable_mosaic.version = 11 : i64} {
  func.func @_combined_conv_kernel(%arg0: i32, %arg1: memref<1x16x32xbf16, #tpu.memory_space<vmem>>, %arg2: memref<8x80xbf16, #tpu.memory_space<vmem>>, %arg3: memref<8x1xf32, #tpu.memory_space<vmem>>, %arg4: memref<1x8x28xf32, #tpu.memory_space<vmem>>, %arg5: memref<2x80x28xbf16, #tpu.memory_space<vmem>>) attributes {dimension_semantics = [#tpu.dimension_semantics<parallel>], iteration_bounds = array<i64: 2>, scalar_prefetch = 0 : i64, scratch_operands = 1 : i64, tpu.core_type = #tpu.core_type<tc>, window_params = [{transform_indices = @transform_0, window_bounds = array<i64: 1, 16, 32>}, {pipeline_mode = #tpu.pipeline_mode<synchronous>, transform_indices = @transform_1, window_bounds = array<i64: 8, 80>}, {pipeline_mode = #tpu.pipeline_mode<synchronous>, transform_indices = @transform_2, window_bounds = array<i64: 8, 1>}, {transform_indices = @transform_3, window_bounds = array<i64: 1, 8, 28>}]} {
    %c0_i32 = arith.constant 0 : i32
    %c2_i32 = arith.constant 2 : i32
    %c0_i32_0 = arith.constant 0 : i32
    %0 = arith.cmpi eq, %c2_i32, %c0_i32_0 : i32
    %c1_i32 = arith.constant 1 : i32
    %1 = arith.select %0, %c1_i32, %c2_i32 : i32
    %2 = arith.remsi %c0_i32, %1 : i32
    %c0_i32_1 = arith.constant 0 : i32
    %3 = arith.cmpi ne, %2, %c0_i32_1 : i32
    %c0_i32_2 = arith.constant 0 : i32
    %4 = arith.cmpi slt, %2, %c0_i32_2 : i32
    %c0_i32_3 = arith.constant 0 : i32
    %5 = arith.cmpi slt, %1, %c0_i32_3 : i32
    %6 = arith.xori %4, %5 : i1
    %7 = arith.andi %6, %3 : i1
    %8 = arith.addi %2, %1 : i32
    %9 = arith.select %7, %8, %2 : i32
    %10 = arith.index_cast %c0_i32 : i32 to index
    %c0 = arith.constant 0 : index
    %c0_4 = arith.constant 0 : index
    %11 = vector.load %arg1[%10, %c0, %c0_4] : memref<1x16x32xbf16, #tpu.memory_space<vmem>>, vector<1x16x32xbf16>
    %12 = vector.shape_cast %11 : vector<1x16x32xbf16> to vector<16x32xbf16>
    %13 = vector.extract_strided_slice %12 {offsets = [0, 0], sizes = [16, 28], strides = [1, 1]} : vector<16x32xbf16> to vector<16x28xbf16>
    %14 = arith.index_cast %9 : i32 to index
    %c0_5 = arith.constant 0 : index
    %c0_6 = arith.constant 0 : index
    %15 = vector.load %arg5[%14, %c0_5, %c0_6] : memref<2x80x28xbf16, #tpu.memory_space<vmem>>, vector<1x16x28xbf16>
    %16 = vector.shape_cast %15 : vector<1x16x28xbf16> to vector<16x28xbf16>
    %17 = vector.shape_cast %13 : vector<16x28xbf16> to vector<1x16x28xbf16>
    tpu.vector_store %arg5[%14, %c0_5, %c0_6], %17 {strides = array<i32>} : memref<2x80x28xbf16, #tpu.memory_space<vmem>>, vector<1x16x28xbf16>,
    %18 = vector.extract_strided_slice %12 {offsets = [0, 1], sizes = [16, 28], strides = [1, 1]} : vector<16x32xbf16> to vector<16x28xbf16>
    %19 = arith.index_cast %9 : i32 to index
    %c16 = arith.constant 16 : index
    %c0_7 = arith.constant 0 : index
    %20 = vector.load %arg5[%19, %c16, %c0_7] : memref<2x80x28xbf16, #tpu.memory_space<vmem>>, vector<1x16x28xbf16>
    %21 = vector.shape_cast %20 : vector<1x16x28xbf16> to vector<16x28xbf16>
    %22 = vector.shape_cast %18 : vector<16x28xbf16> to vector<1x16x28xbf16>
    tpu.vector_store %arg5[%19, %c16, %c0_7], %22 {strides = array<i32>} : memref<2x80x28xbf16, #tpu.memory_space<vmem>>, vector<1x16x28xbf16>,
    %23 = vector.extract_strided_slice %12 {offsets = [0, 2], sizes = [16, 28], strides = [1, 1]} : vector<16x32xbf16> to vector<16x28xbf16>
    %24 = arith.index_cast %9 : i32 to index
    %c32 = arith.constant 32 : index
    %c0_8 = arith.constant 0 : index
    %25 = vector.load %arg5[%24, %c32, %c0_8] : memref<2x80x28xbf16, #tpu.memory_space<vmem>>, vector<1x16x28xbf16>
    %26 = vector.shape_cast %25 : vector<1x16x28xbf16> to vector<16x28xbf16>
    %27 = vector.shape_cast %23 : vector<16x28xbf16> to vector<1x16x28xbf16>
    tpu.vector_store %arg5[%24, %c32, %c0_8], %27 {strides = array<i32>} : memref<2x80x28xbf16, #tpu.memory_space<vmem>>, vector<1x16x28xbf16>,
    %28 = vector.extract_strided_slice %12 {offsets = [0, 3], sizes = [16, 28], strides = [1, 1]} : vector<16x32xbf16> to vector<16x28xbf16>
    %29 = arith.index_cast %9 : i32 to index
    %c48 = arith.constant 48 : index
    %c0_9 = arith.constant 0 : index
    %30 = vector.load %arg5[%29, %c48, %c0_9] : memref<2x80x28xbf16, #tpu.memory_space<vmem>>, vector<1x16x28xbf16>
    %31 = vector.shape_cast %30 : vector<1x16x28xbf16> to vector<16x28xbf16>
    %32 = vector.shape_cast %28 : vector<16x28xbf16> to vector<1x16x28xbf16>
    tpu.vector_store %arg5[%29, %c48, %c0_9], %32 {strides = array<i32>} : memref<2x80x28xbf16, #tpu.memory_space<vmem>>, vector<1x16x28xbf16>,
    %33 = vector.extract_strided_slice %12 {offsets = [0, 4], sizes = [16, 28], strides = [1, 1]} : vector<16x32xbf16> to vector<16x28xbf16>
    %34 = arith.index_cast %9 : i32 to index
    %c64 = arith.constant 64 : index
    %c0_10 = arith.constant 0 : index
    %35 = vector.load %arg5[%34, %c64, %c0_10] : memref<2x80x28xbf16, #tpu.memory_space<vmem>>, vector<1x16x28xbf16>
    %36 = vector.shape_cast %35 : vector<1x16x28xbf16> to vector<16x28xbf16>
    %37 = vector.shape_cast %33 : vector<16x28xbf16> to vector<1x16x28xbf16>
    tpu.vector_store %arg5[%34, %c64, %c0_10], %37 {strides = array<i32>} : memref<2x80x28xbf16, #tpu.memory_space<vmem>>, vector<1x16x28xbf16>,
    %c0_11 = arith.constant 0 : index
    %c0_12 = arith.constant 0 : index
    %38 = vector.load %arg2[%c0_11, %c0_12] : memref<8x80xbf16, #tpu.memory_space<vmem>>, vector<8x80xbf16>
    %39 = arith.index_cast %9 : i32 to index
    %c0_13 = arith.constant 0 : index
    %c0_14 = arith.constant 0 : index
    %40 = vector.load %arg5[%39, %c0_13, %c0_14] : memref<2x80x28xbf16, #tpu.memory_space<vmem>>, vector<1x80x28xbf16>
    %41 = vector.shape_cast %40 : vector<1x80x28xbf16> to vector<80x28xbf16>
    %cst = arith.constant dense<0.000000e+00> : vector<8x28xf32>
    %42 = tpu.matmul %38, %41, %cst {dimension_numbers = #tpu.dot_dimension_numbers<[1], [0], [0], [1], [0, 0, 1, 1], [], []>} : vector<8x80xbf16>, vector<80x28xbf16>, vector<8x28xf32> -> vector<8x28xf32>
    %c0_15 = arith.constant 0 : index
    %c0_16 = arith.constant 0 : index
    %43 = vector.load %arg3[%c0_15, %c0_16] : memref<8x1xf32, #tpu.memory_space<vmem>>, vector<8x1xf32>
    %44 = vector.broadcast %43 : vector<8x1xf32> to vector<8x28xf32>
    %45 = arith.addf %42, %44 : vector<8x28xf32>
    %46 = arith.index_cast %c0_i32 : i32 to index
    %c0_17 = arith.constant 0 : index
    %c0_18 = arith.constant 0 : index
    %47 = vector.load %arg4[%46, %c0_17, %c0_18] : memref<1x8x28xf32, #tpu.memory_space<vmem>>, vector<1x8x28xf32>
    %48 = vector.shape_cast %47 : vector<1x8x28xf32> to vector<8x28xf32>
    %49 = vector.shape_cast %45 : vector<8x28xf32> to vector<1x8x28xf32>
    tpu.vector_store %arg4[%46, %c0_17, %c0_18], %49 {strides = array<i32>} : memref<1x8x28xf32, #tpu.memory_space<vmem>>, vector<1x8x28xf32>,
    %c1_i32_19 = arith.constant 1 : i32
    return
  }
  func.func @transform_0(%arg0: i32) -> (i32, i32, i32) {
    %c0_i32 = arith.constant 0 : i32
    %c0_i32_0 = arith.constant 0 : i32
    %c0_i32_1 = arith.constant 0 : i32
    return %arg0, %c0_i32, %c0_i32_0 : i32, i32, i32
  }
  func.func @transform_1(%arg0: i32) -> (i32, i32) {
    %c0_i32 = arith.constant 0 : i32
    %c0_i32_0 = arith.constant 0 : i32
    %c0_i32_1 = arith.constant 0 : i32
    return %c0_i32, %c0_i32_0 : i32, i32
  }
  func.func @transform_2(%arg0: i32) -> (i32, i32) {
    %c0_i32 = arith.constant 0 : i32
    %c0_i32_0 = arith.constant 0 : i32
    %c0_i32_1 = arith.constant 0 : i32
    return %c0_i32, %c0_i32_0 : i32, i32
  }
  func.func @transform_3(%arg0: i32) -> (i32, i32, i32) {
    %c0_i32 = arith.constant 0 : i32
    %c0_i32_0 = arith.constant 0 : i32
    %c0_i32_1 = arith.constant 0 : i32
    return %arg0, %c0_i32, %c0_i32_0 : i32, i32, i32
  }
}

</mosaic_0001>

<bundles_post_ra>
// kernel: combined_conv_forward.1
= control target key start
LH: loop header
LB: loop body
LE: loop exit
PB: predicated region body
PF: predicated region fallthrough
CT: control target
= control target key end

     0   :  { %8 = vsyncpa [#allocation4], 0  ;;  %s624_s0 = inlined_call_operand.vmem [shape: bf16[2,16,32], index: 0, kind: input, shape index: {}]   ;;  %s625_s1 = inlined_call_operand.vmem [shape: bf16[8,80], index: 1, kind: input, shape index: {}]   ;;  %s626_s2 = inlined_call_operand.vmem [shape: f32[8,1], index: 2, kind: input, shape index: {}]   ;;  %s627_s3 = inlined_call_operand.hbm [shape: f32[2,8,28], index: 3, kind: output, shape index: {}]  }
   0x1   :  { %10 = vsyncpa [#allocation4 + $0x1], 0  ;;  %s523_s12 = smov 0   ;;  %s525_s13 = smov 0  }
   0x2   :  { %s527_s14 = smov 0   ;;  %s529_s15 = smov 0  }
   0x3 LB: > { %s544_s16 = sadd.s32 4294967295, %s496_s15   ;;  %s350_s17 = sadd.s32 4294967294, %s496_s15   ;;  %s496_s15 = sphi %s529_s15, %s633_s15   ;;  %s492_s14 = sphi %s527_s14, %s632_s14   ;;  %s488_s13 = sphi %s525_s13, %s631_s13   ;;  %s484_s12 = sphi %s523_s12, %s630_s12  }
   0x4   : > { %s548_s18 = sadd.s32 1, %s496_s15   ;;  %s91_s19 = sadd.s32 1, %s492_s14 }
   0x5   : > { %s88_s20 = ssub.s32 %s496_s15, %s548_s18  ;;  %p101_p0 = scmp.ne.s32.totalorder %s492_s14, %s488_s13 }
   0x6   : > { %p89_p1 = scmp.eq.s32.totalorder %s88_s20, 0  ;;  %p102_p2 = scmp.eq.s32.totalorder %s544_s16, 1 }
   0x7   : > { %p107_p3 = scmp.ne.s32.totalorder %s488_s13, %s484_s12  ;;  %p108_p4 = scmp.eq.s32.totalorder %s350_s17, 1 }
   0x8   : > { %s559_s21 = scalar_select %p89_p1, %s492_s14, %s91_s19  }
   0x9   : > { %p561_p5 = por %p102_p2, %p101_p0  ;;  %p565_p6 = por %p108_p4, %p107_p3 }
   0xa   : > { %p353_p7 = scmp.ge.s32.totalorder %s496_s15, 1  ;;  %p140_p8 = scmp.lt.s32.totalorder %s496_s15, 3 }
   0xc   : > { %p141_p9 = pnand %p353_p7, %p140_p8 }
   0xd   : > { %p164_p10 = scmp.lt.s32.totalorder (!%p141_p9), %s544_s16, 1  ;;  %s498_s29 = smov (!%p141_p9), 125  }
   0xe   : > { %144 = sbr.rel (%p141_p9) target bundleno = 309 (0x135), region = 32  ;;  %s499_s30 = smov (!%p141_p9), 124  }
   0xf   : > { %s500_s4 = smov (!%p141_p9), 126   ;;  %s501_s5 = smov (!%p141_p9), 127  }
  0x10   : > { %s161_s10 = sand.u32 (!%p141_p9), 1, %s488_s13   ;;  %s379_s11 = sshll.u32 (!%p141_p9), %s544_s16, 3 }
  0x11   : > { %s354_s17 = sshll.u32 (!%p141_p9), %s161_s10, 3 }
  0x13   : > { %s165_s24 = scalar_select %p164_p10, %s544_s16, 1  ;;  %vm172_vm0 = vcmask 224256   ;;  %v220_v6 = vld [vmem:[%s626_s2] sm:$0xff]  ;;  %v502_v7 = vmov 0   ;;  %vm256_vm1 = vcmask 654336   ;;  %vm273_vm2 = vcmask 228352  }
  0x14   : > { %432 = vset.pattern.permute.xlu2 %v502_v7  ;;  %433 = vset.pattern.permute.xlu0 %v502_v7  ;;  %v209_v17 = vld [vmem:[%s625_s1] sm:$0xf] }
  0x15   : > { %s382_s25 = sshll.u32 %s165_s24, 3  ;;  %s286_s24 = scalar_lea.hbm %s627_s3, %s379_s11 }
  0x16   : > { %s168_s28 = scalar_lea.vmem %s624_s0, %s382_s25  ;;  %s163_s25 = scalar_lea.vmem [#allocation3], %s354_s17 }
  0x17   : > { %v170_v0 = vld [vmem:[%s168_s28] sm:$0xf]  ;;  %v171_v1 = vld [vmem:[%s168_s28 + $0x4] sm:$0xf]  ;;  %s288_s26 = sshll.u32 %s163_s25, 4  ;;  %s290_s27 = sshll.u32 %s286_s24, 4  ;;  %s289_s26 = int_to_ptr.vmem [resolvable:$true] %s288_s26  ;;  %s291_s27 = int_to_ptr.hbm [resolvable:$true] %s290_s27 }
  0x18   : > { %193 = vrot.lane.b32.xlu1 %v170_v0, %s498_s29  ;;  %173 = vst.msk [vmem:[#allocation2] sm:$0xf] %vm172_vm0, %v170_v0  ;;  %201 = vrot.lane.b32.xlu0 %v170_v0, %s499_s30  ;;  %s276_s28 = scalar_lea.sflag [#allocation4], %s161_s10 }
  0x19   : > { %174 = vst.msk [vmem:[#allocation2 + $0x4] sm:$0xf] %vm172_vm0, %v171_v1  ;;  %185 = vrot.lane.b32.xlu2 %v170_v0, %s500_s4 }
  0x20   : > { %195 = vrot.lane.b32.xlu1 %v171_v1, %s498_s29  ;;  %203 = vrot.lane.b32.xlu0 %v171_v1, %s499_s30  ;;  %v383_v16 = vld [vmem:[#allocation2] sm:$0xff]  ;;  %s448_s29 = sshra.s32 %s291_s27, 4  ;;  %s449_s29 = int_to_ptr.hbm [resolvable:$true] %s448_s29 }
  0x21   : > { %187 = vrot.lane.b32.xlu2 %v171_v1, %s500_s4  ;;  %s450_s16 = scalar_lea.hbm %s449_s29, 8  ;;  %p455_p0 = scmp.lt.s32.totalorder %s449_s29, %s627_s3 }
  0x22   : > { %p451_p11 = scmp.ne.s32.totalorder %s449_s29, %s450_s16 }
  0x24   : > { %p452_p12 = pnand %p451_p11, %p561_p5 }
  0x26   : > { %p453_p13 = pneg %p452_p12 }
  0x28   : > { %179 = vrot.lane.b32.xlu1 %v171_v1, %s501_s5  ;;  %177 = vrot.lane.b32.xlu0 %v170_v0, %s501_s5  ;;  %s454_s5 = scalar_lea.hbm %s627_s3, 16 }
  0x29   : > { %223 = vperm.xlu2 %432, %v220_v6   ;;  %p456_p1 = scmp.lt.s32.totalorder %s454_s5, %s450_s16 }
  0x2b   : > { %p457_p2 = por %p456_p1, %p455_p0 }
  0x2d   : > { %p458_p3 = pnand %p457_p2, %p453_p13 }
  0x73   : > { %v186_v2 = vpop.permute.xlu2 %185 }
  0x74   : > { %191 = vst.msk [vmem:[#allocation2 + $0x10] sm:$0xf] %vm172_vm0, %v186_v2 }
  0x7b   : > { %v188_v3 = vpop.permute.xlu2 %187 }
  0x7c   : > { %192 = vst.msk [vmem:[#allocation2 + $0x14] sm:$0xf] %vm172_vm0, %v188_v3 }
  0x83   : > { %v385_v14 = vld [vmem:[#allocation2 + $0x10] sm:$0xff]  ;;  %v224_v18 = vpop.permute.xlu2 %223 }
  0x8a   : > { %v194_v4 = vpop.permute.xlu1 %193  ;;  %v202_v5 = vpop.permute.xlu0 %201 }
  0x8b   : > { %199 = vst.msk [vmem:[#allocation2 + $0x18] sm:$0xf] %vm172_vm0, %v194_v4 }
  0x8c   : > { %207 = vst.msk [vmem:[#allocation2 + $0x20] sm:$0xf] %vm172_vm0, %v202_v5 }
  0x92   : > { %v196_v8 = vpop.permute.xlu1 %195  ;;  %v204_v9 = vpop.permute.xlu0 %203 }
  0x93   : > { %200 = vst.msk [vmem:[#allocation2 + $0x1c] sm:$0xf] %vm172_vm0, %v196_v8 }
  0x94   : > { %208 = vst.msk [vmem:[#allocation2 + $0x24] sm:$0xf] %vm172_vm0, %v204_v9 }
  0x9a   : > { %v180_v10 = vpop.permute.xlu1 %179  ;;  %v178_v11 = vpop.permute.xlu0 %177  ;;  %v386_v13 = vld [vmem:[#allocation2 + $0x18] sm:$0xff] }
  0x9b   : > { %v387_v12 = vld [vmem:[#allocation2 + $0x20] sm:$0xff]  ;;  %184 = vst.msk [vmem:[#allocation2 + $0xc] sm:$0xf] %vm172_vm0, %v180_v10 }
  0x9c   : > { %183 = vst.msk [vmem:[#allocation2 + $0x8] sm:$0xf] %vm172_vm0, %v178_v11  ;;  %263 = vmatpush.bf16.msra.mxu0 %v387_v12 }
  0xa0   : > { %264 = vmatpush.bf16.msra.mxu0 %v386_v13 }
  0xa3   : > { %v384_v15 = vld [vmem:[#allocation2 + $0x8] sm:$0xff] }
  0xa4   : > { %265 = vmatpush.bf16.msra.mxu0 %v385_v14 }
  0xa8   : > { %266 = vmatpush.bf16.msra.mxu0 %v384_v15 }
  0xac   : > { %267 = vmatpush.bf16.msra.mxu0 %v383_v16 }
  0xaf   : > { %377 = vmatmul.msk.bf16.vlgmr.msra.gmra.mxu0 %vm256_vm1, %v209_v17 }
 0x12c   : > { %v269_v19 = vpop.f32.mrf.mxu0 }
 0x12d   : > { %v270_v20 = vadd.f32 %v269_v19, %v224_v18 }
 0x12f   : > { %274 = vst.msk [vmem:[%s163_s25] sm:$0xff] %vm273_vm2, %v270_v20 }
 0x130   : > { %461 = shalt.err (!%p458_p3)
}
 0x131   : > { %388 = dma.vmem_to_hbm [thread:$0]  (%p561_p5), %s289_s26, 128, %s291_s27, %s276_s28  }
 0x134   : > { %v271_v21 = vpop.f32.mrf.mxu0 }
 0x135 PF: > { %p394_p4 = scmp.ge.s32.totalorder %s496_s15, 2  ;;  %s302_s8 = sand.u32 1, %s484_s12  }
 0x136   : > { %s303_s9 = scalar_lea.sflag [#allocation4], %s302_s8 }
 0x137   : > { %p391_p7 = pnand %p394_p4, %p565_p6 }
 0x139   : > { %p392_p8 = pneg %p391_p7 }
 0x13b   : > { %479 = dma.done.wait (%p392_p8), %s303_s9, 128  }
 0x13c   : > { %481 = vsyncadd (%p392_p8), %s303_s9, 4294967168  ;;  %p13_p9 = scmp.ge.s32.totalorder %s548_s18, 4   ;;  %s630_s12 = smov %s488_s13 }
 0x13d   : > { %s631_s13 = smov %s492_s14  ;;  %s632_s14 = smov %s559_s21 }
 0x13e   : > { %s633_s15 = smov %s548_s18  ;;  %15 = sbr.rel (!%p13_p9) target bundleno = 3 (0x3), region = 67 }
 0x143   :  { %309 = vsyncpa [#allocation4], 1 }
 0x144   :  { %311 = vsyncpa [#allocation4 + $0x1], 1 }

</bundles_post_ra>
